<compile_context>
chip_gen: v7x
topology: tpu7x:2x2x1
jax: 0.10.0
libtpu: 0.0.40
codegen_flags: <defaults>
</compile_context>

<pallas_src>
import functools

import jax
import jax.numpy as jnp
from jax.experimental import pallas as pl
from jax.experimental.pallas import tpu as pltpu


def se_kernel(x_ref, w1t_ref, w2t_ref, o_ref):
    # x_ref:   (Bt, HW, C)  one block of batch elements, channels-last
    # w1t_ref: (C, hidden)  first linear, transposed
    # w2t_ref: (hidden, C)  second linear, transposed
    x = x_ref[...]
    # Squeeze: global average pool over the spatial (sublane) axis, f32 accum.
    pooled = jnp.mean(x.astype(jnp.float32), axis=1)             # (Bt, C)
    # Excitation: two bias-free linears with ReLU + sigmoid (all f32).
    y1 = jnp.dot(pooled, w1t_ref[...].astype(jnp.float32),
                 preferred_element_type=jnp.float32)             # (Bt, hidden)
    y1 = jnp.maximum(y1, 0.0)
    y2 = jnp.dot(y1, w2t_ref[...].astype(jnp.float32),
                 preferred_element_type=jnp.float32)             # (Bt, C)
    gate = jax.nn.sigmoid(y2)                                    # (Bt, C)
    # Rescale: broadcast the gate over the spatial axis, store in out dtype.
    o_ref[...] = (x * gate[:, None, :]).astype(o_ref.dtype)


def _choose_block_batch(B, HW, C, itemsize,
                        vmem_tile_budget_bytes=24 * 1024 * 1024):
    """Largest Bt dividing B such that (x + out), each double-buffered, fit the
    tile budget, while keeping >= 2 grid steps when B >= 2 (v7x megacore)."""
    per_elem = HW * C * itemsize
    max_bt_vmem = max(1, vmem_tile_budget_bytes // (4 * per_elem))
    max_bt_grid = max(1, B // 2) if B >= 2 else 1
    bt = int(min(B, max_bt_vmem, max_bt_grid))
    while B % bt != 0:
        bt -= 1
    return bt


@functools.partial(jax.jit, static_argnames=("block_batch",))
def se_forward(x_nchw, w1, w2, *, block_batch=None):
    """Squeeze-and-Excitation forward pass.

    x_nchw: (B, C, H, W); w1: (hidden, C); w2: (C, hidden)  (bias-free linears,
    matching nn.Linear(..., bias=False)).  Returns (B, C, H, W) in x's dtype.
    """
    B, C, H, W = x_nchw.shape
    hidden = w1.shape[0]
    HW = H * W
    itemsize = jnp.dtype(x_nchw.dtype).itemsize

    # Channels-last slab for lane-dense in-kernel loads/stores.
    x_cl = jnp.transpose(x_nchw.reshape(B, C, HW), (0, 2, 1))     # (B, HW, C)
    w1t = w1.T.astype(jnp.float32)                                # (C, hidden)
    w2t = w2.T.astype(jnp.float32)                                # (hidden, C)

    bt = block_batch if block_batch is not None else _choose_block_batch(
        B, HW, C, itemsize)
    assert B % bt == 0, (B, bt)
    grid = (B // bt,)

    # TODO(synk): for very large spatial slabs (a Bt=1 tile still over budget),
    # restructure as a two-pass HW-chunked kernel (grid=(B, HW//tile) reduction
    # into a pooled accumulator, then a second pass applying the gate per chunk).

    cost = pl.CostEstimate(
        flops=int(2 * B * C * HW + 4 * B * C * hidden),
        transcendentals=int(B * C),
        bytes_accessed=int(2 * B * HW * C * itemsize + 2 * C * hidden * 4),
    )

    out_cl = pl.pallas_call(
        se_kernel,
        out_shape=jax.ShapeDtypeStruct((B, HW, C), x_cl.dtype),
        grid_spec=pltpu.PrefetchScalarGridSpec(
            num_scalar_prefetch=0,
            grid=grid,
            in_specs=[
                pl.BlockSpec((bt, HW, C), lambda b: (b, 0, 0)),
                # Constant index_map -> weight blocks stay resident across the
                # whole grid (no per-step re-DMA).
                pl.BlockSpec((C, hidden), lambda b: (0, 0)),
                pl.BlockSpec((hidden, C), lambda b: (0, 0)),
            ],
            out_specs=pl.BlockSpec((bt, HW, C), lambda b: (b, 0, 0)),
        ),
        compiler_params=pltpu.CompilerParams(
            dimension_semantics=("parallel",),
            vmem_limit_bytes=32 * 1024 * 1024,
        ),
        cost_estimate=cost,
    )(x_cl, w1t, w2t)

    return jnp.transpose(out_cl, (0, 2, 1)).reshape(B, C, H, W)


def se_reference(x_nchw, w1, w2):
    pooled = jnp.mean(x_nchw.astype(jnp.float32), axis=(2, 3))    # (B, C)
    y = jnp.maximum(pooled @ w1.T.astype(jnp.float32), 0.0)       # (B, hidden)
    y = jax.nn.sigmoid(y @ w2.T.astype(jnp.float32))              # (B, C)
    return (x_nchw.astype(jnp.float32) * y[:, :, None, None])


if __name__ == "__main__":
    B, C, H, W = 2, 32, 8, 8
    reduction = 16
    hidden = C // reduction

    key = jax.random.PRNGKey(0)
    kx, k1, k2 = jax.random.split(key, 3)
    x = jax.random.normal(kx, (B, C, H, W), dtype=jnp.float32)
    # deterministic synthetic weights (bias-free linears, like nn.Linear(..., bias=False))
    w1 = jax.random.normal(k1, (hidden, C), dtype=jnp.float32) * 0.1
    w2 = jax.random.normal(k2, (C, hidden), dtype=jnp.float32) * 0.1

    # f32 path
    out = jax.block_until_ready(se_forward(x, w1, w2))
    ref = se_reference(x, w1, w2)
    assert out.shape == (B, C, H, W)
    assert jnp.allclose(out, ref, atol=1e-5, rtol=1e-5)

    # bf16 I/O path (bandwidth win on v6e/v7x; f32 pooled/gate math inside)
    x_bf16 = x.astype(jnp.bfloat16)
    out_bf16 = jax.block_until_ready(se_forward(x_bf16, w1, w2))
    ref_bf16 = se_reference(x_bf16.astype(jnp.float32), w1, w2)
    assert out_bf16.dtype == jnp.bfloat16
    assert jnp.allclose(out_bf16.astype(jnp.float32), ref_bf16,
                        atol=3e-2, rtol=3e-2)

    print("KERNEL_OK")
</pallas_src>

<mosaic_0001>
module attributes {stable_mosaic.version = 11 : i64} {
  func.func @se_kernel(%arg0: i32, %arg1: memref<1x64x32xf32, #tpu.memory_space<vmem>>, %arg2: memref<32x2xf32, #tpu.memory_space<vmem>>, %arg3: memref<2x32xf32, #tpu.memory_space<vmem>>, %arg4: memref<1x64x32xf32, #tpu.memory_space<vmem>>) attributes {dimension_semantics = [#tpu.dimension_semantics<parallel>], iteration_bounds = array<i64: 2>, scalar_prefetch = 0 : i64, scratch_operands = 0 : i64, tpu.core_type = #tpu.core_type<tc>, window_params = [{transform_indices = @transform_0, window_bounds = array<i64: 1, 64, 32>}, {pipeline_mode = #tpu.pipeline_mode<synchronous>, transform_indices = @transform_1, window_bounds = array<i64: 32, 2>}, {pipeline_mode = #tpu.pipeline_mode<synchronous>, transform_indices = @transform_2, window_bounds = array<i64: 2, 32>}, {transform_indices = @transform_3, window_bounds = array<i64: 1, 64, 32>}]} {
    %c0 = arith.constant 0 : index
    %c0_0 = arith.constant 0 : index
    %c0_1 = arith.constant 0 : index
    %0 = vector.load %arg1[%c0, %c0_0, %c0_1] : memref<1x64x32xf32, #tpu.memory_space<vmem>>, vector<1x64x32xf32>
    %cst = arith.constant dense<0.000000e+00> : vector<1x32xf32>
    %1 = vector.multi_reduction <add>, %0, %cst [1] : vector<1x64x32xf32> to vector<1x32xf32>
    %cst_2 = arith.constant 6.400000e+01 : f32
    %2 = vector.broadcast %cst_2 : f32 to vector<1x32xf32>
    %3 = arith.divf %1, %2 : vector<1x32xf32>
    %c0_3 = arith.constant 0 : index
    %c0_4 = arith.constant 0 : index
    %4 = vector.load %arg2[%c0_3, %c0_4] : memref<32x2xf32, #tpu.memory_space<vmem>>, vector<32x2xf32>
    %cst_5 = arith.constant dense<0.000000e+00> : vector<1x2xf32>
    %5 = tpu.matmul %3, %4, %cst_5 {dimension_numbers = #tpu.dot_dimension_numbers<[1], [0], [0], [1], [0, 0, 1, 1], [], []>} : vector<1x32xf32>, vector<32x2xf32>, vector<1x2xf32> -> vector<1x2xf32>
    %cst_6 = arith.constant 0.000000e+00 : f32
    %6 = vector.broadcast %cst_6 : f32 to vector<1x2xf32>
    %7 = arith.maximumf %5, %6 : vector<1x2xf32>
    %c0_7 = arith.constant 0 : index
    %c0_8 = arith.constant 0 : index
    %8 = vector.load %arg3[%c0_7, %c0_8] : memref<2x32xf32, #tpu.memory_space<vmem>>, vector<2x32xf32>
    %cst_9 = arith.constant dense<0.000000e+00> : vector<1x32xf32>
    %9 = tpu.matmul %7, %8, %cst_9 {dimension_numbers = #tpu.dot_dimension_numbers<[1], [0], [0], [1], [0, 0, 1, 1], [], []>} : vector<1x2xf32>, vector<2x32xf32>, vector<1x32xf32> -> vector<1x32xf32>
    %10 = arith.negf %9 : vector<1x32xf32>
    %11 = math.exp %10 : vector<1x32xf32>
    %cst_10 = arith.constant 1.000000e+00 : f32
    %12 = vector.broadcast %cst_10 : f32 to vector<1x32xf32>
    %13 = arith.addf %12, %11 : vector<1x32xf32>
    %14 = arith.divf %12, %13 : vector<1x32xf32>
    %15 = vector.shape_cast %14 : vector<1x32xf32> to vector<1x1x32xf32>
    %16 = vector.broadcast %15 : vector<1x1x32xf32> to vector<1x64x32xf32>
    %17 = arith.mulf %0, %16 : vector<1x64x32xf32>
    %c0_11 = arith.constant 0 : index
    %c0_12 = arith.constant 0 : index
    %c0_13 = arith.constant 0 : index
    %18 = vector.load %arg4[%c0_11, %c0_12, %c0_13] : memref<1x64x32xf32, #tpu.memory_space<vmem>>, vector<1x64x32xf32>
    tpu.vector_store %arg4[%c0_11, %c0_12, %c0_13], %17 {strides = array<i32>} : memref<1x64x32xf32, #tpu.memory_space<vmem>>, vector<1x64x32xf32>,
    return
  }
  func.func @transform_0(%arg0: i32) -> (i32, i32, i32) {
    %c0_i32 = arith.constant 0 : i32
    %c0_i32_0 = arith.constant 0 : i32
    %c0_i32_1 = arith.constant 0 : i32
    return %arg0, %c0_i32, %c0_i32_0 : i32, i32, i32
  }
  func.func @transform_1(%arg0: i32) -> (i32, i32) {
    %c0_i32 = arith.constant 0 : i32
    %c0_i32_0 = arith.constant 0 : i32
    %c0_i32_1 = arith.constant 0 : i32
    return %c0_i32, %c0_i32_0 : i32, i32
  }
  func.func @transform_2(%arg0: i32) -> (i32, i32) {
    %c0_i32 = arith.constant 0 : i32
    %c0_i32_0 = arith.constant 0 : i32
    %c0_i32_1 = arith.constant 0 : i32
    return %c0_i32, %c0_i32_0 : i32, i32
  }
  func.func @transform_3(%arg0: i32) -> (i32, i32, i32) {
    %c0_i32 = arith.constant 0 : i32
    %c0_i32_0 = arith.constant 0 : i32
    %c0_i32_1 = arith.constant 0 : i32
    return %arg0, %c0_i32, %c0_i32_0 : i32, i32, i32
  }
}

</mosaic_0001>

<bundles_post_ra>
// kernel: se_forward.1
= control target key start
LH: loop header
LB: loop body
LE: loop exit
PB: predicated region body
PF: predicated region fallthrough
CT: control target
= control target key end

     0   :  { %8 = vsyncpa [#allocation3], 0  ;;  %s932_s0 = inlined_call_operand.hbm [shape: f32[2,64,32], index: 0, kind: input, shape index: {}]   ;;  %s933_s1 = inlined_call_operand.vmem [shape: f32[32,2], index: 1, kind: input, shape index: {}]   ;;  %s934_s2 = inlined_call_operand.vmem [shape: f32[2,32], index: 2, kind: input, shape index: {}]   ;;  %s935_s3 = inlined_call_operand.hbm [shape: f32[2,64,32], index: 3, kind: output, shape index: {}]  }
   0x1   :  { %10 = vsyncpa [#allocation3 + $0x1], 0 }
   0x2   :  { %11 = vsyncpa [#allocation4], 0 }
   0x3   :  { %13 = vsyncpa [#allocation4 + $0x1], 0  ;;  %s724_s12 = smov 0   ;;  %s726_s13 = smov 0  }
   0x4   :  { %s728_s14 = smov 0   ;;  %s730_s15 = smov 0  }
   0x5 LB: > { %s745_s16 = sadd.s32 4294967295, %s693_s15   ;;  %s491_s17 = sadd.s32 4294967294, %s693_s15   ;;  %s693_s15 = sphi %s730_s15, %s948_s15   ;;  %s689_s14 = sphi %s728_s14, %s947_s14   ;;  %s685_s13 = sphi %s726_s13, %s946_s13   ;;  %s681_s12 = sphi %s724_s12, %s945_s12  }
   0x6   : > { %s749_s18 = sadd.s32 1, %s693_s15   ;;  %s26_s19 = sadd.s32 1, %s689_s14 }
   0x7   : > { %s23_s20 = ssub.s32 %s693_s15, %s749_s18  ;;  %p33_p0 = scmp.ne.s32.totalorder %s689_s14, %s685_s13 }
   0x8   : > { %p24_p1 = scmp.eq.s32.totalorder %s23_s20, 0  ;;  %p34_p2 = scmp.eq.s32.totalorder %s693_s15, 0 }
   0x9   : > { %p39_p3 = scmp.ne.s32.totalorder %s685_s13, %s681_s12  ;;  %p40_p4 = scmp.eq.s32.totalorder %s745_s16, 0 }
   0xa   : > { %s761_s21 = scalar_select %p24_p1, %s689_s14, %s26_s19  }
   0xb   : > { %p763_p5 = por %p34_p2, %p33_p0  ;;  %p767_p6 = por %p40_p4, %p39_p3 }
   0xc   : > { %p105_p7 = scmp.eq.s32.totalorder %s745_s16, 1  ;;  %p111_p8 = scmp.eq.s32.totalorder %s491_s17, 1 }
   0xd   : > { %p552_p10 = scmp.lt.s32.totalorder %s693_s15, 2  ;;  %s137_s26 = sand.u32 1, %s689_s14  }
   0xe   : > { %p774_p11 = por %p105_p7, %p33_p0  ;;  %p778_p12 = por %p111_p8, %p39_p3 }
   0xf   : > { %s509_s27 = sshll.u32 %s693_s15, 10  ;;  %s494_s28 = sshll.u32 %s137_s26, 6 }
  0x10   : > { %s939_s24 = scalar_select %p774_p11, 1, 0 }
  0x11   : > { %s940_s25 = scalar_select %p778_p12, 1, 0 }
  0x12   : > { %s787_s4 = scalar_lea.hbm %s932_s0, %s509_s27  ;;  %s141_s5 = scalar_lea.vmem [#allocation2], %s494_s28 }
  0x13   : > { %s148_s6 = sshll.u32 %s141_s5, 4  ;;  %p791_p13 = pnand %p552_p10, %p763_p5  ;;  %s795_s6 = int_to_ptr.vmem [resolvable:$true] %s148_s6 }
  0x14   : > { %s797_s8 = scalar_lea.sflag [#allocation3], %s137_s26  ;;  %s597_s9 = scalar_lea.hbm %s787_s4, 1024 }
  0x15   : > { %p598_p0 = scmp.ne.s32.totalorder %s787_s4, %s597_s9  ;;  %p599_p1 = pneg %p791_p13 }
  0x16   : > { %s602_s17 = scalar_lea.hbm %s932_s0, 2048  ;;  %p603_p4 = scmp.lt.u32.totalorder %s787_s4, %s932_s0 }
  0x17   : > { %p600_p2 = pnand %p599_p1, %p598_p0  ;;  %p604_p5 = scmp.lt.u32.totalorder %s602_s17, %s597_s9 }
  0x18   : > { %p606_p8 = scmp.lt.u32.totalorder %s597_s9, %s787_s4 }
  0x19   : > { %p601_p3 = pneg %p600_p2  ;;  %p605_p7 = por %p604_p5, %p603_p4 }
  0x1b   : > { %p607_p10 = por %p606_p8, %p605_p7 }
  0x1d   : > { %p608_p9 = pnand %p607_p10, %p601_p3 }
  0x1f   : > { %611 = shalt.err (!%p608_p9)
}
  0x20   : > { %s612_s22 = scalar_lea.vmem %s795_s6, 1024  ;;  %s695_s26 = smov [#allocation2]  }
  0x21   : > { %p613_p0 = scmp.ne.s32.totalorder %s795_s6, %s612_s22  ;;  %s617_s27 = sshll.u32 %s695_s26, 4  ;;  %s618_s27 = int_to_ptr.vmem [resolvable:$false] %s617_s27 }
  0x22   : > { %s619_s28 = scalar_lea.vmem %s618_s27, 2048  ;;  %p620_p11 = scmp.lt.s32.totalorder %s795_s6, %s618_s27 }
  0x23   : > { %p615_p2 = pnand %p613_p0, %p599_p1  ;;  %p621_p4 = scmp.lt.s32.totalorder %s619_s28, %s612_s22 }
  0x25   : > { %p616_p12 = pneg %p615_p2  ;;  %p622_p5 = por %p621_p4, %p620_p11 }
  0x27   : > { %p623_p7 = pnand %p622_p5, %p616_p12 }
  0x29   : > { %626 = shalt.err (!%p623_p7)
}
  0x2a   : > { %s696_s29 = smov 128   ;;  %s697_s30 = smov 8  }
  0x2b   : > { %547 = dma.hbm_to_vmem [thread:$0]  (!%p791_p13), %s787_s4, 1024, %s795_s6, %s797_s8, %s696_s29, %s696_s29, %s697_s30  }
  0x2c   : > { %p497_p9 = scmp.ge.s32.totalorder %s693_s15, 1  ;;  %p156_p1 = scmp.lt.s32.totalorder %s693_s15, 3 }
  0x2e   : > { %p157_p3 = pnand %p497_p9, %p156_p1 }
  0x2f   : > { %s828_s5 = sand.u32 (!%p157_p3), 1, %s685_s13  }
  0x30   : > { %160 = sbr.rel (%p157_p3) target bundleno = 562 (0x232), region = 32  ;;  %s498_s9 = sshll.u32 (!%p157_p3), %s828_s5, 6 }
  0x31   : > { %s163_s10 = scalar_lea.sflag (!%p157_p3), [#allocation3], %s828_s5  ;;  %s834_s11 = scalar_lea.vmem (!%p157_p3), [#allocation2], %s498_s9 }
  0x37   : > { %672 = dma.done.wait (%p767_p6), %s163_s10, 1024  }
  0x38   : > { %674 = vsyncadd (%p767_p6), %s163_s10, 4294966272  ;;  %v698_v0 = vmov 0.0|0.0   ;;  %vm699_vm0 = vmmov 0   ;;  %v700_v1 = vmov 0.0   ;;  %vm197_vm1 = vcmask 261120   ;;  %v221_v2 = vld [vmem:[%s933_s1] sm:$0xff] }
  0x39   : > { %534 = vmatprep.subr.bf16.mxu0 %v698_v0  ;;  %526 = vmatprep.mubr.msk.f32.mxu0 %vm699_vm0, %v700_v1  ;;  %v222_v3 = vld [vmem:[%s933_s1 + $0x8] sm:$0xff]  ;;  %v223_v4 = vld [vmem:[%s933_s1 + $0x10] sm:$0xff]  ;;  %v224_v6 = vld [vmem:[%s933_s1 + $0x18] sm:$0xff]  ;;  %vm304_vm2 = vcmask 1041408   ;;  %vm300_vm3 = vcmask 15360   ;;  %v384_v47 = vlaneseq  ;;  %s510_s27 = sshll.u32 %s745_s16, 10 }
  0x3a   : > { %529 = vmatprep.subr.mxu1 %v700_v1  ;;  %531 = vmatprep.mubr.msk.f32.mxu1 %vm699_vm0, %v700_v1  ;;  %v535_v5 = vpack.c.bf16 %v222_v3, %v221_v2  ;;  %v189_v7 = vld [vmem:[%s834_s11] sm:$0xff]  ;;  %v190_v8 = vld [vmem:[%s834_s11 + $0x8] sm:$0xff]  ;;  %v191_v9 = vld [vmem:[%s834_s11 + $0x10] sm:$0xff]  ;;  %v538_v13 = vpack.c.bf16 %v224_v6, %v223_v4  ;;  %s188_s28 = scalar_lea.vmem [#allocation5], %s498_s9  ;;  %s405_s16 = scalar_lea.sflag [#allocation4], %s828_s5 }
  0x3b   : > { %v192_v10 = vld [vmem:[%s834_s11 + $0x18] sm:$0xff]  ;;  %v198_v11 = vsel %vm197_vm1, %v189_v7, 0.0  ;;  %v199_v12 = vsel %vm197_vm1, %v190_v8, 0.0  ;;  %v193_v14 = vld [vmem:[%s834_s11 + $0x20] sm:$0xff]  ;;  %v201_v16 = vsel %vm197_vm1, %v191_v9, 0.0  ;;  %v194_v18 = vld [vmem:[%s834_s11 + $0x28] sm:$0xff] }
  0x3c   : > { %536 = vmatpush3.bf16.msra.mxu0 %v535_v5  ;;  %v200_v15 = vadd.f32 %v199_v12, %v198_v11  ;;  %v203_v17 = vsel %vm197_vm1, %v192_v10, 0.0  ;;  %v205_v20 = vsel %vm197_vm1, %v193_v14, 0.0  ;;  %v195_v21 = vld [vmem:[%s834_s11 + $0x30] sm:$0xff]  ;;  %v207_v23 = vsel %vm197_vm1, %v194_v18, 0.0  ;;  %v196_v24 = vld [vmem:[%s834_s11 + $0x38] sm:$0xff]  ;;  %s418_s29 = sshll.u32 %s188_s28, 4  ;;  %s878_s11 = scalar_lea.hbm %s935_s3, %s510_s27  ;;  %s880_s29 = int_to_ptr.vmem [resolvable:$true] %s418_s29 }
  0x3d   : > { %537 = vmatprep.subr.bf16.mxu0 %v698_v0  ;;  %v209_v26 = vsel %vm197_vm1, %v195_v21, 0.0  ;;  %v211_v28 = vsel %vm197_vm1, %v196_v24, 0.0  ;;  %v299_v38 = vld [vmem:[%s934_s2] sm:$0x3]  ;;  %v385_v48 = vshrl.u32 %v384_v47, 7  ;;  %s627_s9 = scalar_lea.vmem %s880_s29, 1024 }
  0x3e   : > { %v202_v19 = vadd.f32 %v201_v16, %v200_v15  ;;  %530 = vmatpush3.msk.msra.mxu1 %vm304_vm2, %v299_v38  ;;  %p628_p6 = scmp.ne.s32.totalorder %s880_s29, %s627_s9  ;;  %p942_p11 = scmp.ne.s32.totalorder %s939_s24, 0 }
  0x3f   : > { %v386_v49 = vsub.s32 0, %v385_v48  ;;  %s701_s4 = smov [#allocation5]  }
  0x40   : > { %539 = vmatpush3.bf16.msra.mxu0 %v538_v13  ;;  %v204_v22 = vadd.f32 %v203_v17, %v202_v19  ;;  %p629_p12 = pnand %p628_p6, %p942_p11  ;;  %s631_s6 = sshll.u32 %s701_s4, 4  ;;  %s632_s6 = int_to_ptr.vmem [resolvable:$false] %s631_s6 }
  0x41   : > { %s633_s7 = scalar_lea.vmem %s632_s6, 2048  ;;  %p634_p8 = scmp.lt.s32.totalorder %s880_s29, %s632_s6 }
  0x42   : > { %v206_v25 = vadd.f32 %v205_v20, %v204_v22  ;;  %p630_p13 = pneg %p629_p12  ;;  %p635_p10 = scmp.lt.s32.totalorder %s633_s7, %s627_s9 }
  0x44   : > { %v208_v27 = vadd.f32 %v207_v23, %v206_v25  ;;  %p636_p0 = por %p635_p10, %p634_p8 }
  0x46   : > { %v210_v29 = vadd.f32 %v209_v26, %v208_v27  ;;  %p637_p2 = pnand %p636_p0, %p630_p13 }
  0x48   : > { %v212_v30 = vadd.f32 %v211_v28, %v210_v29 }
  0x4a   : > { %v213_v31 = vrot.slane %v212_v30, 4 }
  0x4c   : > { %v214_v32 = vadd.f32 %v213_v31, %v212_v30 }
  0x4e   : > { %v215_v33 = vrot.slane %v214_v32, 2 }
  0x50   : > { %v216_v34 = vadd.f32 %v215_v33, %v214_v32 }
  0x52   : > { %v217_v35 = vrot.slane %v216_v34, 1 }
  0x54   : > { %v218_v36 = vadd.f32 %v217_v35, %v216_v34 }
  0x56   : > { %v220_v37 = vmul.f32 0.015625, %v218_v36 }
  0x58   : > { %527 = vmatmul.mubr.msk.f32.vlgmr.msra.gmra.mrb[0].mxu0 %vm197_vm1, %v220_v37 }
 0x12b   : > { %v294_v39 = vpop.f32.mrb[0].mxu0 }
 0x12c   : > { %v298_v40 = vmax.f32 %v294_v39, 0.0  ;;  %v528_v41 = vpop.f32.mrb[1].mxu0 }
 0x12e   : > { %532 = vmatmul.mubr.msk.f32.vlgmr.msra.gmra.mrb[0].mxu1 %vm300_vm3, %v298_v40 }
 0x201   : > { %v374_v42 = vpop.f32.mrb[0].mxu1 }
 0x202   : > { %v503_v43 = vmul.f32 -1.442695, %v374_v42  ;;  %v533_v44 = vpop.f32.mrb[1].mxu1 }
 0x204   : > { %593 = vpow2.f32 %v503_v43 }
 0x20e   : > { %v594_v45 = vpop.eup %593 }
 0x20f   : > { %v381_v46 = vadd.f32 1.0, %v594_v45 }
 0x211   : > { %595 = vrcp.f32 %v381_v46 }
 0x21b   : > { %v596_v50 = vpop.eup %595 }
 0x21c   : > { %v387_v51 = vrot.slane %v596_v50, %v386_v49 }
 0x21e   : > { %v388_v52 = vmul.f32 %v387_v51, %v189_v7  ;;  %v389_v53 = vmul.f32 %v387_v51, %v190_v8  ;;  %v390_v54 = vmul.f32 %v387_v51, %v191_v9  ;;  %v391_v55 = vmul.f32 %v387_v51, %v192_v10 }
 0x21f   : > { %v392_v56 = vmul.f32 %v387_v51, %v193_v14  ;;  %v393_v57 = vmul.f32 %v387_v51, %v194_v18  ;;  %v394_v58 = vmul.f32 %v387_v51, %v195_v21  ;;  %v395_v59 = vmul.f32 %v387_v51, %v196_v24 }
 0x220   : > { %396 = vst.msk [vmem:[%s188_s28] sm:$0xff] %vm197_vm1, %v388_v52  ;;  %397 = vst.msk [vmem:[%s188_s28 + $0x8] sm:$0xff] %vm197_vm1, %v389_v53 }
 0x221   : > { %398 = vst.msk [vmem:[%s188_s28 + $0x10] sm:$0xff] %vm197_vm1, %v390_v54  ;;  %399 = vst.msk [vmem:[%s188_s28 + $0x18] sm:$0xff] %vm197_vm1, %v391_v55 }
 0x222   : > { %400 = vst.msk [vmem:[%s188_s28 + $0x20] sm:$0xff] %vm197_vm1, %v392_v56  ;;  %401 = vst.msk [vmem:[%s188_s28 + $0x28] sm:$0xff] %vm197_vm1, %v393_v57 }
 0x223   : > { %402 = vst.msk [vmem:[%s188_s28 + $0x30] sm:$0xff] %vm197_vm1, %v394_v58  ;;  %403 = vst.msk [vmem:[%s188_s28 + $0x38] sm:$0xff] %vm197_vm1, %v395_v59 }
 0x224   : > { %640 = shalt.err (!%p637_p2)
}
 0x225   : > { %s641_s23 = scalar_lea.hbm %s878_s11, 1024  ;;  %s645_s19 = scalar_lea.hbm %s935_s3, 2048 }
 0x226   : > { %p642_p4 = scmp.ne.s32.totalorder %s878_s11, %s641_s23  ;;  %p646_p9 = scmp.lt.u32.totalorder %s878_s11, %s935_s3 }
 0x227   : > { %p647_p1 = scmp.lt.u32.totalorder %s645_s19, %s641_s23  ;;  %p649_p6 = scmp.lt.u32.totalorder %s641_s23, %s878_s11 }
 0x228   : > { %p643_p5 = pnand %p642_p4, %p942_p11 }
 0x229   : > { %p648_p3 = por %p647_p1, %p646_p9 }
 0x22a   : > { %p644_p7 = pneg %p643_p5 }
 0x22b   : > { %p650_p12 = por %p649_p6, %p648_p3 }
 0x22d   : > { %p651_p13 = pnand %p650_p12, %p644_p7 }
 0x22f   : > { %654 = shalt.err (!%p651_p13)
}
 0x230   : > { %s702_s26 = smov 128   ;;  %s703_s27 = smov 8  }
 0x231   : > { %542 = dma.vmem_to_hbm [thread:$0]  (%p942_p11), %s880_s29, 1024, %s878_s11, %s405_s16, %s702_s26, %s702_s26, %s703_s27  }
 0x232 PF: > { %s433_s28 = sand.u32 1, %s681_s12   ;;  %p943_p8 = scmp.ne.s32.totalorder %s940_s25, 0 }
 0x233   : > { %p944_p10 = scmp.ge.s32.totalorder %s693_s15, 2  ;;  %s434_s30 = scalar_lea.sflag [#allocation4], %s433_s28 }
 0x235   : > { %p549_p0 = pnand %p944_p10, %p943_p8 }
 0x237   : > { %676 = dma.done.wait (!%p549_p0), %s434_s30, 1024  }
 0x238   : > { %678 = vsyncadd (!%p549_p0), %s434_s30, 4294966272  ;;  %p16_p2 = scmp.ge.s32.totalorder %s749_s18, 4   ;;  %s945_s12 = smov %s685_s13 }
 0x239   : > { %s946_s13 = smov %s689_s14  ;;  %s947_s14 = smov %s761_s21 }
 0x23a   : > { %s948_s15 = smov %s749_s18  ;;  %18 = sbr.rel (!%p16_p2) target bundleno = 5 (0x5), region = 77 }
 0x241   :  { %439 = vsyncpa [#allocation3], 1 }
 0x242   :  { %441 = vsyncpa [#allocation3 + $0x1], 1 }
 0x243   :  { %442 = vsyncpa [#allocation4], 1 }
 0x244   :  { %444 = vsyncpa [#allocation4 + $0x1], 1 }

</bundles_post_ra>
